<compile_context>
chip_gen: v6e
topology: v6e:2x2x1
jax: 0.10.0
libtpu: 0.0.40
codegen_flags: <defaults>
</compile_context>

<pallas_src>
import functools

import jax
import jax.numpy as jnp
from jax.experimental import pallas as pl
from jax.experimental.pallas import tpu as pltpu


def _merge_kernel(x_ref, w_ref, b_ref, o_ref, *, use_mxu):
    # x_ref: (Cin, TL)   activation tile, lanes = spatial
    # w_ref: (Cout, Cin) resident weight
    # b_ref: (Cout, 1)   resident bias
    # o_ref: (Cout, TL)  output tile, lanes = spatial
    if use_mxu:
        # Only worthwhile when Cin/Cout are MXU-sized.
        acc = jnp.dot(w_ref[...], x_ref[...], preferred_element_type=jnp.float32)
    else:
        # VPU path: Cin fused multiply-adds over lane-dense vregs.
        x = x_ref[...]
        cin = x.shape[0]
        acc = w_ref[:, 0:1] * x[0:1, :]          # (Cout,1)*(1,TL) -> (Cout,TL)
        for ci in range(1, cin):                 # static unroll (Cin is tiny)
            acc = acc + w_ref[:, ci:ci + 1] * x[ci:ci + 1, :]
    o_ref[...] = (acc + b_ref[...]).astype(o_ref.dtype)


def merge_forward(x_nchw, weight, bias, *, max_tile_lanes=4096):
    """1x1 conv + bias (PyTorch Merge.forward) via a Pallas kernel.

    x_nchw : (N, Cin, H, W)  float32
    weight : (Cout, Cin)     float32  (PyTorch conv weight (Cout, Cin, 1, 1) squeezed)
    bias   : (Cout,)         float32
    returns (N, Cout, H, W)  float32
    """
    n, cin, h, w = x_nchw.shape
    cout = weight.shape[0]
    hw = h * w

    # Free reshapes only -- no transposes, no extra HBM passes.
    x3 = x_nchw.reshape(n, cin, hw)          # (N, Cin, HW)
    b2 = bias.reshape(cout, 1)               # (Cout, 1)

    # Lane-tile: take the whole spatial extent when it is small; otherwise tile
    # at a multiple of 128 and let Pallas mask the tail block.
    tl = hw if hw <= max_tile_lanes else max_tile_lanes
    grid = (n, pl.cdiv(hw, tl))

    # MXU only pays off for large channel counts; otherwise stay on the VPU.
    use_mxu = (cin >= 128 and cout >= 128)
    kernel = functools.partial(_merge_kernel, use_mxu=use_mxu)

    itemsize = jnp.dtype(x_nchw.dtype).itemsize
    cost = pl.CostEstimate(
        flops=2 * n * hw * cin * cout,
        transcendentals=0,
        bytes_accessed=itemsize * (n * cin * hw + cin * cout + cout + n * cout * hw),
    )

    out3 = pl.pallas_call(
        kernel,
        out_shape=jax.ShapeDtypeStruct((n, cout, hw), x_nchw.dtype),
        grid_spec=pltpu.PrefetchScalarGridSpec(
            num_scalar_prefetch=0,
            grid=grid,
            in_specs=[
                # activation tile: batch dim squeezed, full Cin, TL lanes
                pl.BlockSpec((pl.Squeezed(), cin, tl), lambda b, l: (b, 0, l)),
                # resident weight / bias (constant index_map -> no re-DMA)
                pl.BlockSpec((cout, cin), lambda b, l: (0, 0)),
                pl.BlockSpec((cout, 1), lambda b, l: (0, 0)),
            ],
            out_specs=pl.BlockSpec((pl.Squeezed(), cout, tl), lambda b, l: (b, 0, l)),
        ),
        compiler_params=pltpu.CompilerParams(
            dimension_semantics=("parallel", "parallel"),
            # Explicit scoped-VMEM budget: safe on v5e/v6e (128 MiB) and
            # v7x (64 MiB).  Per-step footprint here is only ~100s of KiB.
            vmem_limit_bytes=32 * 1024 * 1024,
        ),
        cost_estimate=cost,
    )(x3, weight, b2)

    # (N, Cout, HW) -> (N, Cout, H, W): free reshape, no transpose.
    return out3.reshape(n, cout, h, w)


if __name__ == "__main__":
    key = jax.random.PRNGKey(0)
    kx, kw, kb = jax.random.split(key, 3)

    # Merge(x_dim=4, y_dim=8) on a (2, 4, 16, 16) NCHW input.
    batch, x_dim, y_dim, spatial = 2, 4, 8, 16
    x = jax.random.normal(kx, (batch, x_dim, spatial, spatial), dtype=jnp.float32)

    # Deterministic synthetic parameters (shapes match nn.Conv2d(x_dim, y_dim, 1)).
    weight = jax.random.normal(kw, (y_dim, x_dim), dtype=jnp.float32) * 0.1
    bias = jax.random.normal(kb, (y_dim,), dtype=jnp.float32) * 0.1

    out = merge_forward(x, weight, bias)
    jax.block_until_ready(out)

    # Reference check in plain JAX (1x1 conv == per-pixel matmul).
    ref = jnp.einsum("nchw,oc->nohw", x, weight) + bias[None, :, None, None]
    assert out.shape == (batch, y_dim, spatial, spatial)
    assert jnp.allclose(out, ref, atol=1e-5, rtol=1e-5)

    print("KERNEL_OK")
</pallas_src>

<mosaic_0001>
module attributes {stable_mosaic.version = 11 : i64} {
  func.func @_merge_kernel(%arg0: i32, %arg1: i32, %arg2: memref<1x4x256xf32, #tpu.memory_space<vmem>>, %arg3: memref<8x4xf32, #tpu.memory_space<vmem>>, %arg4: memref<8x1xf32, #tpu.memory_space<vmem>>, %arg5: memref<1x8x256xf32, #tpu.memory_space<vmem>>) attributes {dimension_semantics = [#tpu.dimension_semantics<parallel>, #tpu.dimension_semantics<parallel>], iteration_bounds = array<i64: 2, 1>, scalar_prefetch = 0 : i64, scratch_operands = 0 : i64, tpu.core_type = #tpu.core_type<tc>, window_params = [{transform_indices = @transform_0, window_bounds = array<i64: 1, 4, 256>}, {pipeline_mode = #tpu.pipeline_mode<synchronous>, transform_indices = @transform_1, window_bounds = array<i64: 8, 4>}, {pipeline_mode = #tpu.pipeline_mode<synchronous>, transform_indices = @transform_2, window_bounds = array<i64: 8, 1>}, {transform_indices = @transform_3, window_bounds = array<i64: 1, 8, 256>}]} {
    %c0 = arith.constant 0 : index
    %c0_0 = arith.constant 0 : index
    %c0_1 = arith.constant 0 : index
    %0 = vector.load %arg2[%c0, %c0_0, %c0_1] : memref<1x4x256xf32, #tpu.memory_space<vmem>>, vector<1x4x256xf32>
    %1 = vector.shape_cast %0 : vector<1x4x256xf32> to vector<4x256xf32>
    %c0_2 = arith.constant 0 : index
    %c0_3 = arith.constant 0 : index
    %2 = vector.load %arg3[%c0_2, %c0_3] : memref<8x4xf32, #tpu.memory_space<vmem>>, vector<8x1xf32>
    %3 = vector.extract_strided_slice %1 {offsets = [0, 0], sizes = [1, 256], strides = [1, 1]} : vector<4x256xf32> to vector<1x256xf32>
    %4 = vector.broadcast %2 : vector<8x1xf32> to vector<8x256xf32>
    %5 = vector.broadcast %3 : vector<1x256xf32> to vector<8x256xf32>
    %6 = arith.mulf %4, %5 : vector<8x256xf32>
    %c0_4 = arith.constant 0 : index
    %c1 = arith.constant 1 : index
    %7 = vector.load %arg3[%c0_4, %c1] : memref<8x4xf32, #tpu.memory_space<vmem>>, vector<8x1xf32>
    %8 = vector.extract_strided_slice %1 {offsets = [1, 0], sizes = [1, 256], strides = [1, 1]} : vector<4x256xf32> to vector<1x256xf32>
    %9 = vector.broadcast %7 : vector<8x1xf32> to vector<8x256xf32>
    %10 = vector.broadcast %8 : vector<1x256xf32> to vector<8x256xf32>
    %11 = arith.mulf %9, %10 : vector<8x256xf32>
    %12 = arith.addf %6, %11 : vector<8x256xf32>
    %c0_5 = arith.constant 0 : index
    %c2 = arith.constant 2 : index
    %13 = vector.load %arg3[%c0_5, %c2] : memref<8x4xf32, #tpu.memory_space<vmem>>, vector<8x1xf32>
    %14 = vector.extract_strided_slice %1 {offsets = [2, 0], sizes = [1, 256], strides = [1, 1]} : vector<4x256xf32> to vector<1x256xf32>
    %15 = vector.broadcast %13 : vector<8x1xf32> to vector<8x256xf32>
    %16 = vector.broadcast %14 : vector<1x256xf32> to vector<8x256xf32>
    %17 = arith.mulf %15, %16 : vector<8x256xf32>
    %18 = arith.addf %12, %17 : vector<8x256xf32>
    %c0_6 = arith.constant 0 : index
    %c3 = arith.constant 3 : index
    %19 = vector.load %arg3[%c0_6, %c3] : memref<8x4xf32, #tpu.memory_space<vmem>>, vector<8x1xf32>
    %20 = vector.extract_strided_slice %1 {offsets = [3, 0], sizes = [1, 256], strides = [1, 1]} : vector<4x256xf32> to vector<1x256xf32>
    %21 = vector.broadcast %19 : vector<8x1xf32> to vector<8x256xf32>
    %22 = vector.broadcast %20 : vector<1x256xf32> to vector<8x256xf32>
    %23 = arith.mulf %21, %22 : vector<8x256xf32>
    %24 = arith.addf %18, %23 : vector<8x256xf32>
    %c0_7 = arith.constant 0 : index
    %c0_8 = arith.constant 0 : index
    %25 = vector.load %arg4[%c0_7, %c0_8] : memref<8x1xf32, #tpu.memory_space<vmem>>, vector<8x1xf32>
    %26 = vector.broadcast %25 : vector<8x1xf32> to vector<8x256xf32>
    %27 = arith.addf %24, %26 : vector<8x256xf32>
    %c0_9 = arith.constant 0 : index
    %c0_10 = arith.constant 0 : index
    %c0_11 = arith.constant 0 : index
    %28 = vector.load %arg5[%c0_9, %c0_10, %c0_11] : memref<1x8x256xf32, #tpu.memory_space<vmem>>, vector<1x8x256xf32>
    %29 = vector.shape_cast %28 : vector<1x8x256xf32> to vector<8x256xf32>
    %30 = vector.shape_cast %27 : vector<8x256xf32> to vector<1x8x256xf32>
    tpu.vector_store %arg5[%c0_9, %c0_10, %c0_11], %30 {strides = array<i32>} : memref<1x8x256xf32, #tpu.memory_space<vmem>>, vector<1x8x256xf32>,
    return
  }
  func.func @transform_0(%arg0: i32, %arg1: i32) -> (i32, i32, i32) {
    %c0_i32 = arith.constant 0 : i32
    %c0_i32_0 = arith.constant 0 : i32
    return %arg0, %c0_i32, %arg1 : i32, i32, i32
  }
  func.func @transform_1(%arg0: i32, %arg1: i32) -> (i32, i32) {
    %c0_i32 = arith.constant 0 : i32
    %c0_i32_0 = arith.constant 0 : i32
    %c0_i32_1 = arith.constant 0 : i32
    return %c0_i32, %c0_i32_0 : i32, i32
  }
  func.func @transform_2(%arg0: i32, %arg1: i32) -> (i32, i32) {
    %c0_i32 = arith.constant 0 : i32
    %c0_i32_0 = arith.constant 0 : i32
    %c0_i32_1 = arith.constant 0 : i32
    return %c0_i32, %c0_i32_0 : i32, i32
  }
  func.func @transform_3(%arg0: i32, %arg1: i32) -> (i32, i32, i32) {
    %c0_i32 = arith.constant 0 : i32
    %c0_i32_0 = arith.constant 0 : i32
    return %arg0, %c0_i32, %arg1 : i32, i32, i32
  }
}

</mosaic_0001>

<bundles_post_ra>
// kernel: tpu_custom_call.1
= control target key start
LH: loop header
LB: loop body
LE: loop exit
PB: predicated region body
PF: predicated region fallthrough
CT: control target
= control target key end

     0   :  { %8 = vsyncpa [#allocation3], 0  ;;  %s707_s0 = inlined_call_operand.vmem [shape: f32[2,4,256], index: 0, kind: input, shape index: {}]   ;;  %s708_s1 = inlined_call_operand.vmem [shape: f32[8,4], index: 1, kind: input, shape index: {}]   ;;  %s709_s2 = inlined_call_operand.vmem [shape: f32[8,1], index: 2, kind: input, shape index: {}]   ;;  %s710_s3 = inlined_call_operand.hbm [shape: f32[2,8,256], index: 3, kind: output, shape index: {}]  }
   0x1   :  { %10 = vsyncpa [#allocation3 + $0x1], 0  ;;  %s592_s12 = smov 0   ;;  %s594_s13 = smov 0  }
   0x2   :  { %s596_s14 = smov 0   ;;  %s598_s15 = smov 0  }
   0x3   :  { %s600_s16 = smov 0   ;;  %s602_s17 = smov 0  }
   0x4 LB: > { %s409_s18 = sadd.s32 4294967295, %s565_s17   ;;  %s410_s19 = sadd.s32 4294967294, %s565_s17   ;;  %s565_s17 = sphi %s602_s17, %s16_s17   ;;  %s561_s16 = sphi %s600_s16, %s717_s16   ;;  %s557_s15 = sphi %s598_s15, %s716_s15   ;;  %s553_s14 = sphi %s596_s14, %s715_s14   ;;  %s549_s13 = sphi %s594_s13, %s714_s13   ;;  %s545_s12 = sphi %s592_s12, %s713_s12  }
   0x5   : > { %s28_s20 = sadd.s32 1, %s561_s16  ;;  %s107_s21 = sadd.s32 1, %s553_s14 }
   0x6   : > { %p30_p0 = scmp.ge.s32.totalorder %s28_s20, 2  ;;  %p117_p1 = scmp.ne.s32.totalorder %s553_s14, %s549_s13 }
   0x7   : > { %p118_p2 = scmp.eq.s32.totalorder %s409_s18, 1  ;;  %p123_p3 = scmp.ne.s32.totalorder %s549_s13, %s545_s12 }
   0x8   : > { %s719_s20 = smov (%p30_p0, %s28_s20), 0  ;;  %p124_p5 = scmp.eq.s32.totalorder %s410_s19, 1 }
   0x9   : > { %p632_p4 = por %p118_p2, %p117_p1  ;;  %s102_s23 = ssub.s32 %s561_s16, %s719_s20 }
   0xa   : > { %p413_p6 = scmp.ge.s32.totalorder %s565_s17, 1  ;;  %p105_p7 = scmp.eq.s32.totalorder %s102_s23, 0 }
   0xb   : > { %p639_p8 = por %p124_p5, %p123_p3  ;;  %p161_p9 = scmp.lt.s32.totalorder %s565_s17, 3 }
   0xc   : > { %s645_s25 = scalar_select %p105_p7, %s553_s14, %s107_s21  }
   0xd   : > { %p162_p10 = pnand %p413_p6, %p161_p9 }
   0xe   : > { %p190_p11 = scmp.lt.s32.totalorder (!%p162_p10), %s557_s15, 1  ;;  %s186_s8 = sand.u32 (!%p162_p10), 1, %s549_s13  }
   0xf   : > { %165 = sbr.rel (%p162_p10) target bundleno = 174 (0xae), region = 32  ;;  %s414_s9 = sshll.u32 (!%p162_p10), %s186_s8, 4 }
  0x10   : > { %s423_s10 = sshll.u32 (!%p162_p10), %s557_s15, 8  ;;  %s188_s11 = scalar_lea.vmem (!%p162_p10), [#allocation2], %s414_s9 }
  0x11   : > { %s333_s18 = sshll.u32 (!%p162_p10), %s188_s11, 4  ;;  %s665_s23 = scalar_lea.hbm (!%p162_p10), %s710_s3, %s423_s10  ;;  %s334_s18 = int_to_ptr.vmem [resolvable:$true] %s333_s18 }
  0x12   : > { %s317_s26 = scalar_lea.sflag (!%p162_p10), [#allocation3], %s186_s8  ;;  %s489_s27 = scalar_lea.vmem (!%p162_p10), %s334_s18, 256 }
  0x13   : > { %p490_p12 = scmp.ne.s32.totalorder (!%p162_p10), %s334_s18, %s489_s27 }
  0x14   : > { %v201_v0 = vld [vmem:[%s708_s1] sm:$0xff]  ;;  %v567_v1 = vmov 0   ;;  %v568_v2 = vmov 2   ;;  %v569_v3 = vmov 1   ;;  %v570_v4 = vmov 3   ;;  %s191_s30 = scalar_select %p190_p11, %s557_s15, 1 }
  0x15   : > { %483 = vset.pattern.permute.xlu0 %v567_v1  ;;  %485 = vset.pattern.permute.xlu1 %v568_v2  ;;  %v306_v5 = vld [vmem:[%s709_s2] sm:$0xff]  ;;  %v208_v6 = vlaneseq  ;;  %p491_p13 = pnand %p490_p12, %p632_p4  ;;  %s571_s15 = smov [#allocation2]  }
  0x16   : > { %204 = vperm.xlu0 %483, %v201_v0   ;;  %255 = vperm.xlu1 %485, %v201_v0   ;;  %s422_s4 = sshll.u32 %s191_s30, 3  ;;  %s493_s28 = sshll.u32 %s571_s15, 4  ;;  %s494_s28 = int_to_ptr.vmem [resolvable:$false] %s493_s28 }
  0x17   : > { %v209_v7 = vshrl.u32 %v208_v6, 7  ;;  %s197_s7 = scalar_lea.vmem %s707_s0, %s422_s4  ;;  %p492_p0 = pneg %p491_p13 }
  0x18   : > { %v200_v12 = vld [vmem:[%s197_s7] sm:$0xff]  ;;  %s495_s29 = scalar_lea.vmem %s494_s28, 512  ;;  %p496_p1 = scmp.lt.s32.totalorder %s334_s18, %s494_s28 }
  0x19   : > { %v210_v8 = vsub.s32 0, %v209_v7  ;;  %v214_v9 = vsub.s32 4, %v209_v7  ;;  %v234_v10 = vsub.s32 1, %v209_v7  ;;  %v238_v11 = vsub.s32 5, %v209_v7  ;;  %p497_p2 = scmp.lt.s32.totalorder %s495_s29, %s489_s27 }
  0x1a   : > { %484 = vset.pattern.permute.xlu0 %v569_v3  ;;  %486 = vset.pattern.permute.xlu1 %v570_v4  ;;  %v260_v13 = vsub.s32 2, %v209_v7  ;;  %v264_v14 = vsub.s32 6, %v209_v7  ;;  %v286_v15 = vsub.s32 3, %v209_v7  ;;  %v290_v16 = vsub.s32 7, %v209_v7 }
  0x1b   : > { %229 = vperm.xlu0 %484, %v201_v0   ;;  %281 = vperm.xlu1 %486, %v201_v0   ;;  %v211_v17 = vrot.slane %v200_v12, %v210_v8  ;;  %v215_v18 = vrot.slane %v200_v12, %v214_v9  ;;  %v235_v19 = vrot.slane %v200_v12, %v234_v10  ;;  %p498_p3 = por %p497_p2, %p496_p1 }
  0x1c   : > { %v239_v20 = vrot.slane %v200_v12, %v238_v11  ;;  %v261_v21 = vrot.slane %v200_v12, %v260_v13  ;;  %v265_v22 = vrot.slane %v200_v12, %v264_v14  ;;  %v287_v25 = vrot.slane %v200_v12, %v286_v15 }
  0x1d   : > { %v291_v26 = vrot.slane %v200_v12, %v290_v16  ;;  %v221_v27 = vrot.slane %v211_v17, %v210_v8  ;;  %v225_v28 = vrot.slane %v215_v18, %v210_v8  ;;  %v245_v29 = vrot.slane %v235_v19, %v234_v10  ;;  %p499_p5 = pnand %p498_p3, %p492_p0 }
  0x1e   : > { %v249_v30 = vrot.slane %v239_v20, %v234_v10  ;;  %v271_v31 = vrot.slane %v261_v21, %v260_v13  ;;  %v275_v32 = vrot.slane %v265_v22, %v260_v13  ;;  %v297_v33 = vrot.slane %v287_v25, %v286_v15 }
  0x1f   : > { %487 = vset.pattern.permute.xlu1 %v567_v1  ;;  %488 = vset.pattern.permute.xlu0 %v567_v1  ;;  %v301_v34 = vrot.slane %v291_v26, %v286_v15 }
  0x20   : > { %309 = vperm.xlu1 %487, %v306_v5  }
  0x91   : > { %v205_v23 = vpop.permute.xlu0 %204  ;;  %v256_v24 = vpop.permute.xlu1 %255 }
  0x92   : > { %v226_v37 = vmul.f32 %v221_v27, %v205_v23  ;;  %v227_v38 = vmul.f32 %v225_v28, %v205_v23  ;;  %v276_v41 = vmul.f32 %v271_v31, %v256_v24  ;;  %v277_v42 = vmul.f32 %v275_v32, %v256_v24 }
  0x96   : > { %v230_v35 = vpop.permute.xlu0 %229  ;;  %v282_v36 = vpop.permute.xlu1 %281 }
  0x97   : > { %v250_v39 = vmul.f32 %v245_v29, %v230_v35  ;;  %v251_v40 = vmul.f32 %v249_v30, %v230_v35  ;;  %v302_v45 = vmul.f32 %v297_v33, %v282_v36  ;;  %v303_v46 = vmul.f32 %v301_v34, %v282_v36 }
  0x99   : > { %v252_v43 = vadd.f32 %v250_v39, %v226_v37  ;;  %v253_v44 = vadd.f32 %v251_v40, %v227_v38 }
  0x9b   : > { %v278_v47 = vadd.f32 %v276_v41, %v252_v43  ;;  %v279_v48 = vadd.f32 %v277_v42, %v253_v44  ;;  %v310_v49 = vpop.permute.xlu1 %309 }
  0x9d   : > { %v304_v50 = vadd.f32 %v302_v45, %v278_v47  ;;  %v305_v51 = vadd.f32 %v303_v46, %v279_v48 }
  0x9f   : > { %v312_v52 = vadd.f32 %v310_v49, %v304_v50  ;;  %v313_v53 = vadd.f32 %v310_v49, %v305_v51 }
  0xa1   : > { %314 = vst [vmem:[%s188_s11] sm:$0xff] %v312_v52  ;;  %315 = vst [vmem:[%s188_s11 + $0x8] sm:$0xff] %v313_v53 }
  0xa2   : > { %502 = shalt.err (!%p499_p5)
}
  0xa3   : > { %s503_s30 = scalar_lea.hbm %s665_s23, 256  ;;  %s507_s6 = scalar_lea.hbm %s710_s3, 512 }
  0xa4   : > { %p504_p6 = scmp.ne.s32.totalorder %s665_s23, %s503_s30  ;;  %p508_p10 = scmp.lt.s32.totalorder %s665_s23, %s710_s3 }
  0xa5   : > { %p509_p11 = scmp.lt.s32.totalorder %s507_s6, %s503_s30 }
  0xa6   : > { %p505_p7 = pnand %p504_p6, %p632_p4 }
  0xa7   : > { %p510_p12 = por %p509_p11, %p508_p10 }
  0xa8   : > { %p506_p9 = pneg %p505_p7 }
  0xaa   : > { %p511_p13 = pnand %p510_p12, %p506_p9 }
  0xac   : > { %514 = shalt.err (!%p511_p13)
}
  0xad   : > { %424 = dma.vmem_to_hbm [thread:$0]  (%p632_p4), %s334_s18, 256, %s665_s23, %s317_s26  }
  0xae PF: > { %p430_p0 = scmp.ge.s32.totalorder %s565_s17, 2  ;;  %s345_s9 = sand.u32 1, %s545_s12  }
  0xaf   : > { %s346_s10 = scalar_lea.sflag [#allocation3], %s345_s9 }
  0xb0   : > { %p427_p1 = pnand %p430_p0, %p639_p8 }
  0xb2   : > { %p428_p2 = pneg %p427_p1 }
  0xb4   : > { %540 = dma.done.wait (%p428_p2), %s346_s10, 256  }
  0xb5   : > { %542 = vsyncadd (%p428_p2), %s346_s10, 4294967040  ;;  %s16_s17 = sadd.s32 1, %s565_s17   ;;  %s713_s12 = smov %s549_s13 }
  0xb6   : > { %p13_p3 = scmp.ge.s32.totalorder %s16_s17, 4   ;;  %s714_s13 = smov %s553_s14 }
  0xb7   : > { %s715_s14 = smov %s645_s25  ;;  %s716_s15 = smov %s561_s16 }
  0xb8   : > { %s717_s16 = smov %s719_s20  ;;  %15 = sbr.rel (!%p13_p3) target bundleno = 4 (0x4), region = 67 }
  0xbd   :  { %351 = vsyncpa [#allocation3], 1 }
  0xbe   :  { %353 = vsyncpa [#allocation3 + $0x1], 1 }

</bundles_post_ra>
